<compile_context>
chip_gen: v5e
topology: v5e:2x2
jax: 0.10.0
libtpu: 0.0.40
codegen_flags: <defaults>
</compile_context>

<pallas_src>
import functools

import jax
import jax.numpy as jnp
from jax import lax
from jax.experimental import pallas as pl
from jax.experimental.pallas import tpu as pltpu

EPS = 1e-5  # nn.BatchNorm2d default eps


# ----------------------------------------------------------------------------- kernels

def _stats(h):
    """Per-channel (sum, sumsq) partials of an (C, Mt) f32 tile -> (1, C, 2)."""
    s = jnp.sum(h, axis=1, keepdims=True)
    ss = jnp.sum(h * h, axis=1, keepdims=True)
    return jnp.concatenate([s, ss], axis=1)[None]


def _conv1_kernel(x_ref, w1t_ref, h1_ref, st_ref):
    # 1x1 conv: (Cmid, Cin) @ (Cin, Mt), bf16 operands, f32 accumulation.
    h = jnp.dot(w1t_ref[...].astype(jnp.bfloat16),
                x_ref[...].astype(jnp.bfloat16),
                preferred_element_type=jnp.float32)
    h1_ref[...] = h.astype(h1_ref.dtype)
    st_ref[...] = _stats(h)


def _conv2_kernel(H, W, h1_ref, sc_ref, sh_ref, w2f_ref, h2_ref, st_ref):
    # bn1 + relu, then the 3x3 same-padded conv as ONE (Cmid, 9*Cmid) @ (9*Cmid, Mt) matmul.
    _, mt = h1_ref.shape
    hw = H * W
    act = jnp.maximum(h1_ref[...].astype(jnp.float32) * sc_ref[...] + sh_ref[...], 0.0)

    # Tiles are image-aligned, so the in-tile pixel index mod H*W is the in-image index.
    lin = lax.broadcasted_iota(jnp.int32, (1, mt), 1)
    pix = lin % hw
    i_idx = pix // W
    j_idx = pix % W
    row_ok = [(i_idx + di >= 0) & (i_idx + di < H) for di in (-1, 0, 1)]
    col_ok = [(j_idx + dj >= 0) & (j_idx + dj < W) for dj in (-1, 0, 1)]

    taps = []
    for ri, di in enumerate((-1, 0, 1)):
        for ci, dj in enumerate((-1, 0, 1)):
            off = di * W + dj
            if off == 0:
                shifted = act
            else:
                # shifted[:, m] == act[:, (m + off) % mt]; wrapped values are masked below.
                shifted = pltpu.roll(act, shift=(-off) % mt, axis=1)
            taps.append(jnp.where(row_ok[ri] & col_ok[ci], shifted, 0.0))
    patches = jnp.concatenate(taps, axis=0)                          # (9*Cmid, Mt)

    h = jnp.dot(w2f_ref[...].astype(jnp.bfloat16),
                patches.astype(jnp.bfloat16),
                preferred_element_type=jnp.float32)                  # (Cmid, Mt)
    h2_ref[...] = h.astype(h2_ref.dtype)
    st_ref[...] = _stats(h)


def _conv3_kernel(h2_ref, sc_ref, sh_ref, w3t_ref, h3_ref, st_ref):
    # bn2 + relu, then 1x1 conv: (Cout, Cmid) @ (Cmid, Mt).
    act = jnp.maximum(h2_ref[...].astype(jnp.float32) * sc_ref[...] + sh_ref[...], 0.0)
    h = jnp.dot(w3t_ref[...].astype(jnp.bfloat16),
                act.astype(jnp.bfloat16),
                preferred_element_type=jnp.float32)                  # (Cout, Mt)
    h3_ref[...] = h.astype(h3_ref.dtype)
    st_ref[...] = _stats(h)


def _bn_add_relu_kernel(h3_ref, x_ref, sc_ref, sh_ref, y_ref):
    # bn3 + identity residual + relu (downsample is None).
    y = h3_ref[...].astype(jnp.float32) * sc_ref[...] + sh_ref[...] + x_ref[...]
    y_ref[...] = jnp.maximum(y, 0.0)


# ----------------------------------------------------------------------------- wrapper

def _pick_tile_pixels(M, hw, target=4096):
    """Largest image-aligned, 128-lane-aligned pixel tile <= target (fallback: smallest valid)."""
    n_img = M // hw
    valid = []
    for ipb in range(1, n_img + 1):
        if n_img % ipb:
            continue
        mt = ipb * hw
        if mt % 128 == 0 or mt == M:      # lane rule: multiple of 128 OR full extent
            valid.append(mt)
    small = [m for m in valid if m <= target]
    return max(small) if small else min(valid)


def _bn_coeffs(st, count, gamma, beta):
    """Fold batch statistics into a single per-channel (scale, shift) pair."""
    s = jnp.sum(st[..., 0], axis=0)
    ss = jnp.sum(st[..., 1], axis=0)
    mean = s / count
    var = ss / count - mean * mean        # biased variance (PyTorch train-mode normalization)
    inv = lax.rsqrt(var + EPS)
    scale = gamma * inv
    shift = beta - mean * scale
    return scale.reshape(-1, 1).astype(jnp.float32), shift.reshape(-1, 1).astype(jnp.float32)


def bottleneck_forward(x_nchw, w1, w2, w3, g1, b1, g2, b2, g3, b3):
    """x_nchw: (N, Cin, H, W); w1: (Cin, Cmid); w2: (3,3,Cmid,Cmid) HWIO; w3: (Cmid, Cout)."""
    N, c_in, H, W = x_nchw.shape
    c_mid = w1.shape[1]
    c_out = w3.shape[1]
    assert c_out == c_in, "downsample=None requires inplanes == planes * expansion"
    M = N * H * W
    hw = H * W
    mt = _pick_tile_pixels(M, hw)
    G = M // mt
    f32 = jnp.float32

    # Lane-dense layout: channels on sublanes, pixels (n-major, then h, then w) on lanes.
    xT = jnp.transpose(x_nchw, (1, 0, 2, 3)).reshape(c_in, M).astype(f32)
    w1t = jnp.transpose(w1, (1, 0))                                   # (Cmid, Cin)
    w2f = jnp.transpose(w2, (3, 0, 1, 2)).reshape(c_mid, 9 * c_mid)   # (Cmid, 9*Cmid)
    w3t = jnp.transpose(w3, (1, 0))                                   # (Cout, Cmid)

    parallel = pltpu.CompilerParams(dimension_semantics=("parallel",))

    def act_spec(c):
        return pl.BlockSpec((c, mt), lambda i: (0, i))

    def full_spec(shape):
        return pl.BlockSpec(shape, lambda i: (0,) * len(shape))

    def st_spec(c):
        return pl.BlockSpec((1, c, 2), lambda i: (i, 0, 0))

    # ---- pass 1: conv1 (1x1) + bn1 partial stats ----
    h1, st1 = pl.pallas_call(
        _conv1_kernel,
        grid=(G,),
        in_specs=[act_spec(c_in), full_spec((c_mid, c_in))],
        out_specs=(act_spec(c_mid), st_spec(c_mid)),
        out_shape=(jax.ShapeDtypeStruct((c_mid, M), jnp.bfloat16),
                   jax.ShapeDtypeStruct((G, c_mid, 2), f32)),
        compiler_params=parallel,
        cost_estimate=pl.CostEstimate(
            flops=2 * M * c_in * c_mid, transcendentals=0,
            bytes_accessed=4 * M * c_in + 2 * M * c_mid + 4 * c_in * c_mid),
    )(xT, w1t)
    sc1, sh1 = _bn_coeffs(st1, M, g1, b1)

    # ---- pass 2: bn1 + relu -> conv2 (3x3, fused 9-tap matmul) + bn2 partial stats ----
    h2, st2 = pl.pallas_call(
        functools.partial(_conv2_kernel, H, W),
        grid=(G,),
        in_specs=[act_spec(c_mid), full_spec((c_mid, 1)), full_spec((c_mid, 1)),
                  full_spec((c_mid, 9 * c_mid))],
        out_specs=(act_spec(c_mid), st_spec(c_mid)),
        out_shape=(jax.ShapeDtypeStruct((c_mid, M), jnp.bfloat16),
                   jax.ShapeDtypeStruct((G, c_mid, 2), f32)),
        compiler_params=parallel,
        cost_estimate=pl.CostEstimate(
            flops=2 * M * 9 * c_mid * c_mid, transcendentals=0,
            bytes_accessed=4 * M * c_mid + 36 * c_mid * c_mid),
    )(h1, sc1, sh1, w2f)
    sc2, sh2 = _bn_coeffs(st2, M, g2, b2)

    # ---- pass 3: bn2 + relu -> conv3 (1x1) + bn3 partial stats ----
    h3, st3 = pl.pallas_call(
        _conv3_kernel,
        grid=(G,),
        in_specs=[act_spec(c_mid), full_spec((c_mid, 1)), full_spec((c_mid, 1)),
                  full_spec((c_out, c_mid))],
        out_specs=(act_spec(c_out), st_spec(c_out)),
        out_shape=(jax.ShapeDtypeStruct((c_out, M), jnp.bfloat16),
                   jax.ShapeDtypeStruct((G, c_out, 2), f32)),
        compiler_params=parallel,
        cost_estimate=pl.CostEstimate(
            flops=2 * M * c_mid * c_out, transcendentals=0,
            bytes_accessed=2 * M * c_mid + 2 * M * c_out + 4 * c_mid * c_out),
    )(h2, sc2, sh2, w3t)
    sc3, sh3 = _bn_coeffs(st3, M, g3, b3)

    # ---- pass 4: bn3 + identity residual + relu ----
    yT = pl.pallas_call(
        _bn_add_relu_kernel,
        grid=(G,),
        in_specs=[act_spec(c_out), act_spec(c_out),
                  full_spec((c_out, 1)), full_spec((c_out, 1))],
        out_specs=act_spec(c_out),
        out_shape=jax.ShapeDtypeStruct((c_out, M), f32),
        compiler_params=parallel,
        cost_estimate=pl.CostEstimate(
            flops=3 * M * c_out, transcendentals=0,
            bytes_accessed=2 * M * c_out + 4 * M * c_out + 4 * M * c_out),
    )(h3, xT, sc3, sh3)

    return yT.reshape(c_out, N, H, W).transpose(1, 0, 2, 3)           # back to NCHW


# ----------------------------------------------------------------------------- reference

def bottleneck_ref(x_nchw, w1, w2, w3, g1, b1, g2, b2, g3, b3):
    """Pure-JAX reference (lax.conv, f32 HIGHEST) matching the PyTorch module in train mode."""
    prec = lax.Precision.HIGHEST

    def conv(x, w, padding):
        return lax.conv_general_dilated(
            x, w, window_strides=(1, 1), padding=padding,
            dimension_numbers=("NHWC", "HWIO", "NHWC"), precision=prec)

    def bn(x, g, b):
        mean = jnp.mean(x, axis=(0, 1, 2), keepdims=True)
        var = jnp.mean((x - mean) ** 2, axis=(0, 1, 2), keepdims=True)
        return ((x - mean) * lax.rsqrt(var + EPS)
                * g.reshape(1, 1, 1, -1) + b.reshape(1, 1, 1, -1))

    xh = jnp.transpose(x_nchw, (0, 2, 3, 1))
    o = conv(xh, w1[None, None], "VALID")
    o = jax.nn.relu(bn(o, g1, b1))
    o = conv(o, w2, "SAME")
    o = jax.nn.relu(bn(o, g2, b2))
    o = conv(o, w3[None, None], "VALID")
    o = bn(o, g3, b3)
    o = jax.nn.relu(o + xh)
    return jnp.transpose(o, (0, 3, 1, 2))


if __name__ == "__main__":
    # BottleNeck(inplanes=16, planes=4): conv1 16->4, conv2 4->4 (3x3), conv3 4->16.
    N, inplanes, planes = 2, 16, 4
    H = W = 8
    c_mid, c_out = planes, planes * 4

    key = jax.random.PRNGKey(0)
    ks = jax.random.split(key, 10)
    x = jax.random.normal(ks[0], (N, inplanes, H, W), jnp.float32)
    w1 = 0.2 * jax.random.normal(ks[1], (inplanes, c_mid), jnp.float32)
    w2 = 0.2 * jax.random.normal(ks[2], (3, 3, c_mid, c_mid), jnp.float32)
    w3 = 0.2 * jax.random.normal(ks[3], (c_mid, c_out), jnp.float32)
    g1 = 1.0 + 0.1 * jax.random.normal(ks[4], (c_mid,), jnp.float32)
    b1 = 0.1 * jax.random.normal(ks[5], (c_mid,), jnp.float32)
    g2 = 1.0 + 0.1 * jax.random.normal(ks[6], (c_mid,), jnp.float32)
    b2 = 0.1 * jax.random.normal(ks[7], (c_mid,), jnp.float32)
    g3 = 1.0 + 0.1 * jax.random.normal(ks[8], (c_out,), jnp.float32)
    b3 = 0.1 * jax.random.normal(ks[9], (c_out,), jnp.float32)

    out = bottleneck_forward(x, w1, w2, w3, g1, b1, g2, b2, g3, b3)
    out = jax.block_until_ready(out)

    ref = bottleneck_ref(x, w1, w2, w3, g1, b1, g2, b2, g3, b3)
    assert out.shape == (N, c_out, H, W)
    # bf16 matmul operands + bf16 intermediate storage -> slightly looser tolerance vs f32 ref.
    assert jnp.allclose(out, ref, rtol=3e-2, atol=3e-2), "mismatch vs reference"
    print("KERNEL_OK")
</pallas_src>

<mosaic_0001>
module attributes {stable_mosaic.version = 11 : i64} {
  func.func @_conv1_kernel(%arg0: i32, %arg1: memref<16x128xf32, #tpu.memory_space<vmem>>, %arg2: memref<4x16xf32, #tpu.memory_space<vmem>>, %arg3: memref<4x128xbf16, #tpu.memory_space<vmem>>, %arg4: memref<1x4x2xf32, #tpu.memory_space<vmem>>) attributes {dimension_semantics = [#tpu.dimension_semantics<parallel>], iteration_bounds = array<i64: 1>, scalar_prefetch = 0 : i64, scratch_operands = 0 : i64, tpu.core_type = #tpu.core_type<tc>, window_params = [{transform_indices = @transform_0, window_bounds = array<i64: 16, 128>}, {pipeline_mode = #tpu.pipeline_mode<synchronous>, transform_indices = @transform_1, window_bounds = array<i64: 4, 16>}, {transform_indices = @transform_2, window_bounds = array<i64: 4, 128>}, {transform_indices = @transform_3, window_bounds = array<i64: 1, 4, 2>}]} {
    %c0 = arith.constant 0 : index
    %c0_0 = arith.constant 0 : index
    %0 = vector.load %arg2[%c0, %c0_0] : memref<4x16xf32, #tpu.memory_space<vmem>>, vector<4x16xf32>
    %1 = arith.truncf %0 : vector<4x16xf32> to vector<4x16xbf16>
    %c0_1 = arith.constant 0 : index
    %c0_2 = arith.constant 0 : index
    %2 = vector.load %arg1[%c0_1, %c0_2] : memref<16x128xf32, #tpu.memory_space<vmem>>, vector<16x128xf32>
    %3 = arith.truncf %2 : vector<16x128xf32> to vector<16x128xbf16>
    %cst = arith.constant dense<0.000000e+00> : vector<4x128xf32>
    %4 = tpu.matmul %1, %3, %cst {dimension_numbers = #tpu.dot_dimension_numbers<[1], [0], [0], [1], [0, 0, 1, 1], [], []>} : vector<4x16xbf16>, vector<16x128xbf16>, vector<4x128xf32> -> vector<4x128xf32>
    %5 = arith.truncf %4 : vector<4x128xf32> to vector<4x128xbf16>
    %c0_3 = arith.constant 0 : index
    %c0_4 = arith.constant 0 : index
    %6 = vector.load %arg3[%c0_3, %c0_4] : memref<4x128xbf16, #tpu.memory_space<vmem>>, vector<4x128xbf16>
    tpu.vector_store %arg3[%c0_3, %c0_4], %5 {strides = array<i32>} : memref<4x128xbf16, #tpu.memory_space<vmem>>, vector<4x128xbf16>,
    %cst_5 = arith.constant dense<0.000000e+00> : vector<4xf32>
    %7 = vector.multi_reduction <add>, %4, %cst_5 [1] : vector<4x128xf32> to vector<4xf32>
    %8 = vector.shape_cast %7 : vector<4xf32> to vector<4x1xf32>
    %9 = arith.mulf %4, %4 : vector<4x128xf32>
    %cst_6 = arith.constant dense<0.000000e+00> : vector<4xf32>
    %10 = vector.multi_reduction <add>, %9, %cst_6 [1] : vector<4x128xf32> to vector<4xf32>
    %11 = vector.shape_cast %10 : vector<4xf32> to vector<4x1xf32>
    %12 = tpu.concatenate %8, %11 in 1 : vector<4x1xf32>, vector<4x1xf32> -> vector<4x2xf32>
    %13 = vector.shape_cast %12 : vector<4x2xf32> to vector<1x4x2xf32>
    %c0_7 = arith.constant 0 : index
    %c0_8 = arith.constant 0 : index
    %c0_9 = arith.constant 0 : index
    %14 = vector.load %arg4[%c0_7, %c0_8, %c0_9] : memref<1x4x2xf32, #tpu.memory_space<vmem>>, vector<1x4x2xf32>
    tpu.vector_store %arg4[%c0_7, %c0_8, %c0_9], %13 {strides = array<i32>} : memref<1x4x2xf32, #tpu.memory_space<vmem>>, vector<1x4x2xf32>,
    return
  }
  func.func @transform_0(%arg0: i32) -> (i32, i32) {
    %c0_i32 = arith.constant 0 : i32
    %c0_i32_0 = arith.constant 0 : i32
    return %c0_i32, %arg0 : i32, i32
  }
  func.func @transform_1(%arg0: i32) -> (i32, i32) {
    %c0_i32 = arith.constant 0 : i32
    %c0_i32_0 = arith.constant 0 : i32
    %c0_i32_1 = arith.constant 0 : i32
    return %c0_i32, %c0_i32_0 : i32, i32
  }
  func.func @transform_2(%arg0: i32) -> (i32, i32) {
    %c0_i32 = arith.constant 0 : i32
    %c0_i32_0 = arith.constant 0 : i32
    return %c0_i32, %arg0 : i32, i32
  }
  func.func @transform_3(%arg0: i32) -> (i32, i32, i32) {
    %c0_i32 = arith.constant 0 : i32
    %c0_i32_0 = arith.constant 0 : i32
    %c0_i32_1 = arith.constant 0 : i32
    return %arg0, %c0_i32, %c0_i32_0 : i32, i32, i32
  }
}

</mosaic_0001>

<bundles_post_ra>
// kernel: tpu_custom_call.1
= control target key start
LH: loop header
LB: loop body
LE: loop exit
PB: predicated region body
PF: predicated region fallthrough
CT: control target
= control target key end

     0   :  { %9 = vsyncpa [#allocation3], 0  ;;  %s224_s0 = inlined_call_operand.hbm [shape: f32[16,128], index: 0, kind: input, shape index: {}]   ;;  %s225_s1 = inlined_call_operand.hbm [shape: f32[4,16], index: 1, kind: input, shape index: {}]   ;;  %s226_s2 = inlined_call_operand.hbm [shape: bf16[4,128], index: 2, kind: output, shape index: {0}]   ;;  %s227_s3 = inlined_call_operand.vmem [shape: f32[1,4,2], index: 3, kind: output, shape index: {1}]  }
   0x1   :  { %10 = vsyncpa [#allocation6], 0 }
   0x2   :  { %11 = vsyncpa [#allocation4], 0  ;;  %s16_s14 = sshll.u32 %s224_s0, 4  ;;  %s187_s15 = smov [#allocation2]   ;;  %s17_s14 = int_to_ptr.hbm [resolvable:$true] %s16_s14 }
   0x3   :  { %s18_s16 = sshll.u32 %s187_s15, 4  ;;  %s30_s19 = sshll.u32 %s225_s1, 4  ;;  %s19_s16 = int_to_ptr.vmem [resolvable:$true] %s18_s16  ;;  %s31_s19 = int_to_ptr.hbm [resolvable:$true] %s30_s19 }
   0x4   :  { %s188_s20 = smov 128   ;;  %s189_s21 = smov 8  }
   0x5   :  { %24 = dma.hbm_to_vmem [thread:$0]  %s17_s14, 256, %s19_s16, [#allocation3], %s188_s20, %s188_s20, %s189_s21  }
   0x6   :  { %s190_s22 = smov [#allocation5]  }
   0x7   :  { %s32_s23 = sshll.u32 %s190_s22, 4  ;;  %s33_s23 = int_to_ptr.vmem [resolvable:$true] %s32_s23 }
   0x8   :  { %35 = dma.hbm_to_vmem [thread:$0]  %s31_s19, 64, %s33_s23, [#allocation6]  }
   0x9   :  { %181 = dma.done.wait [#allocation3], 256  }
   0xa   :  { %182 = vsyncadd [#allocation3], 4294967040 }
   0xb   :  { %183 = dma.done.wait [#allocation6], 64  }
   0xc   :  { %184 = vsyncadd [#allocation6], 4294967232  ;;  %v47_v0 = vld [vmem:[#allocation2] sm:$0xff]  ;;  %v48_v1 = vld [vmem:[#allocation2 + $0x8] sm:$0xff]  ;;  %vm50_vm0 = vcmask 130048   ;;  %vm69_vm1 = vcmask 1043456  }
   0xd   :  { %v45_v2 = vld [vmem:[#allocation5] sm:$0xf]  ;;  %v49_v3 = vpack.c.bf16 %v48_v1, %v47_v0  ;;  %s191_s0 = smov [#allocation7]   ;;  %s88_s26 = sshll.u32 %s226_s2, 4  ;;  %vm77_vm2 = vcmask 7168   ;;  %vm79_vm3 = vcmask 11264   ;;  %s89_s26 = int_to_ptr.hbm [resolvable:$true] %s88_s26 }
   0xe   :  { %v46_v4 = vpack.c.bf16 %v45_v2, %v45_v2  ;;  %s86_s1 = sshll.u32 %s191_s0, 4  ;;  %s87_s1 = int_to_ptr.vmem [resolvable:$true] %s86_s1 }
   0xf   :  { %61 = vmatpush.bf16.msra.mxu0 %v49_v3 }
  0x12   :  { %103 = vmatmul.msk.bf16.vlgmr.msra.gmra.mxu0 %vm50_vm0, %v46_v4 }
  0x8f   :  { %v63_v5 = vpop.f32.mrf.mxu0 }
  0x90   :  { %v67_v6 = vpack.c.bf16 %v63_v5, %v63_v5  ;;  %v70_v7 = vsel %vm69_vm1, %v63_v5, 0.0  ;;  %v73_v8 = vmul.f32 %v63_v5, %v63_v5 }
  0x91   :  { %71 = vadd.xlane.f32.xlu0 %v70_v7 }
  0x92   :  { %68 = vst [vmem:[#allocation7] sm:$0x3] %v67_v6  ;;  %v74_v10 = vsel %vm69_vm1, %v73_v8, 0.0 }
  0x93   :  { %91 = dma.vmem_to_hbm [thread:$0]  %s87_s1, 32, %s89_s26, [#allocation4]  }
  0x97   :  { %v65_v9 = vpop.f32.mrf.mxu0 }
  0x99   :  { %75 = vadd.xlane.f32.xlu0 %v74_v10 }
 0x104   :  { %v72_v11 = vpop.xlane.xlu0 %71 }
 0x10c   :  { %v76_v12 = vpop.xlane.xlu0 %75 }
 0x10d   :  { %v78_v13 = vsel %vm77_vm2, %v72_v11, %v76_v12 }
 0x10e   :  { %80 = vst.msk [vmem:[%s227_s3] sm:$0xf] %vm79_vm3, %v78_v13 }
 0x10f   :  { %185 = dma.done.wait [#allocation4], 32  }
 0x110   :  { %186 = vsyncadd [#allocation4], 4294967264 }
 0x111   :  { %100 = vsyncpa [#allocation3], 1 }
 0x112   :  { %101 = vsyncpa [#allocation6], 1 }
 0x113   :  { %102 = vsyncpa [#allocation4], 1 }

</bundles_post_ra>
